<compile_context>
chip_gen: v5e
topology: v5e:2x2
jax: 0.10.0
libtpu: 0.0.40
codegen_flags: <defaults>
</compile_context>

<pallas_src>
import functools

import jax
import jax.numpy as jnp
from jax import lax
from jax.experimental import pallas as pl
from jax.experimental.pallas import tpu as pltpu


_LANE_W = 1024     # lane-dense slab width (multiple of 128)
_TILE_ROWS = 1024  # rows per grid block (multiple of 8) -> 4 MiB f32 / buffer


def _dropout_kernel(x_ref, o_ref, *, threshold, inv_keep, seed, tile_rows, width):
    # Global element index of every lane in this tile (tiling-independent).
    row = lax.broadcasted_iota(jnp.int32, x_ref.shape, 0).astype(jnp.uint32)
    col = lax.broadcasted_iota(jnp.int32, x_ref.shape, 1).astype(jnp.uint32)
    row_off = lax.convert_element_type(pl.program_id(0), jnp.uint32) * jnp.uint32(tile_rows)
    gidx = (row + row_off) * jnp.uint32(width) + col

    # Stateless counter-based PRNG: lowbias32 integer hash of (index, seed).
    h = gidx * jnp.uint32(0x9E3779B9) + jnp.uint32(seed)
    h = h ^ (h >> 16)
    h = h * jnp.uint32(0x21F0AAAD)
    h = h ^ (h >> 15)
    h = h * jnp.uint32(0x735A2D97)
    h = h ^ (h >> 15)

    keep = h < jnp.uint32(threshold)          # Bernoulli(keep_prob), exact to 2^-32
    xv = x_ref[...]
    scale = jnp.asarray(inv_keep, dtype=xv.dtype)
    o_ref[...] = jnp.where(keep, xv * scale, jnp.zeros_like(xv))


def dropout_forward(x: jax.Array, p: float, seed: int, training: bool = True) -> jax.Array:
    """Pallas TPU implementation of DropoutLayer.forward (inverted dropout)."""
    if p < 0 or p >= 1:
        raise ValueError("Dropout rate must be between 0 and 1 (1-exclusive)")
    if not training or p == 0.0:
        # p == 0: mask is all-ones and scale is 1 -> identity.
        return x

    orig_shape = x.shape
    dtype = x.dtype
    total = x.size
    if total == 0:
        return x

    keep_prob = 1.0 - float(p)
    threshold = min(int(round(keep_prob * (1 << 32))), (1 << 32) - 1)
    inv_keep = 1.0 / keep_prob

    # Lane-dense slab width; avoid padding when the size already divides.
    width = _LANE_W if total >= _LANE_W else 128
    pad = (-total) % width
    x_flat = jnp.ravel(x)
    if pad:
        x_flat = jnp.concatenate([x_flat, jnp.zeros((pad,), dtype=dtype)])
    rows = (total + pad) // width
    x2 = x_flat.reshape(rows, width)

    # Block rows: full extent for small inputs, else 1024-row tiles (mult. of 8).
    tile_rows = rows if rows <= _TILE_ROWS else _TILE_ROWS
    grid = (pl.cdiv(rows, tile_rows),)

    kernel = functools.partial(
        _dropout_kernel,
        threshold=threshold,
        inv_keep=inv_keep,
        seed=int(seed) & 0xFFFFFFFF,
        tile_rows=tile_rows,
        width=width,
    )

    out2 = pl.pallas_call(
        kernel,
        out_shape=jax.ShapeDtypeStruct((rows, width), dtype),
        grid=grid,
        in_specs=[pl.BlockSpec((tile_rows, width), lambda i: (i, 0))],
        out_specs=pl.BlockSpec((tile_rows, width), lambda i: (i, 0)),
        compiler_params=pltpu.CompilerParams(
            dimension_semantics=("parallel",)),
    )(x2)

    out_flat = out2.reshape(-1)
    if pad:
        out_flat = out_flat[:total]
    return out_flat.reshape(orig_shape)


if __name__ == "__main__":
    key = jax.random.PRNGKey(0)
    p = 0.3

    # Small NCHW input consistent with an elementwise dropout layer.
    x = jax.random.normal(key, (2, 4, 16, 16), dtype=jnp.float32)

    y_train = dropout_forward(x, p=p, seed=1234, training=True)
    y_eval = dropout_forward(x, p=p, seed=1234, training=False)
    jax.block_until_ready(y_train)
    jax.block_until_ready(y_eval)

    # Eval mode is identity.
    assert y_eval.shape == x.shape
    assert bool(jnp.allclose(y_eval, x))

    # Every surviving element equals x / (1 - p); dropped elements are 0.
    scaled = x * jnp.float32(1.0 / (1.0 - p))
    is_zero = jnp.isclose(y_train, 0.0, atol=1e-6)
    is_scaled = jnp.isclose(y_train, scaled, rtol=1e-4, atol=1e-6)
    assert bool(jnp.all(is_zero | is_scaled))

    # Roughly (1 - p) of the elements survive.
    keep_frac = float(jnp.mean((~is_zero).astype(jnp.float32)))
    assert abs(keep_frac - (1.0 - p)) < 0.12

    # Larger input to exercise the multi-block pipelined grid path.
    x_big = jax.random.normal(jax.random.PRNGKey(1), (8, 16, 128, 128), dtype=jnp.float32)
    y_big = dropout_forward(x_big, p=p, seed=7, training=True)
    jax.block_until_ready(y_big)
    scaled_big = x_big * jnp.float32(1.0 / (1.0 - p))
    zero_big = jnp.isclose(y_big, 0.0, atol=1e-6)
    ok_big = zero_big | jnp.isclose(y_big, scaled_big, rtol=1e-4, atol=1e-6)
    assert bool(jnp.all(ok_big))
    keep_big = float(jnp.mean((~zero_big).astype(jnp.float32)))
    assert abs(keep_big - (1.0 - p)) < 0.05

    print("KERNEL_OK")
</pallas_src>

<mosaic_0001>
module attributes {stable_mosaic.version = 11 : i64} {
  func.func @_dropout_kernel(%arg0: i32, %arg1: memref<2x1024xf32, #tpu.memory_space<vmem>>, %arg2: memref<2x1024xf32, #tpu.memory_space<vmem>>) attributes {dimension_semantics = [#tpu.dimension_semantics<parallel>], iteration_bounds = array<i64: 1>, scalar_prefetch = 0 : i64, scratch_operands = 0 : i64, tpu.core_type = #tpu.core_type<tc>, window_params = [{transform_indices = @transform_0, window_bounds = array<i64: 2, 1024>}, {transform_indices = @transform_1, window_bounds = array<i64: 2, 1024>}]} {
    %0 = tpu.iota {dimensions = array<i32: 0>} : vector<2x1024xi32>
    %1 = tpu.iota {dimensions = array<i32: 1>} : vector<2x1024xi32>
    %c2_i32 = arith.constant 2 : i32
    %2 = arith.muli %arg0, %c2_i32 : i32
    %3 = vector.broadcast %2 : i32 to vector<2x1024xi32>
    %4 = arith.addi %0, %3 : vector<2x1024xi32>
    %c1024_i32 = arith.constant 1024 : i32
    %5 = vector.broadcast %c1024_i32 : i32 to vector<2x1024xi32>
    %6 = arith.muli %4, %5 : vector<2x1024xi32>
    %7 = arith.addi %6, %1 : vector<2x1024xi32>
    %c-1640531527_i32 = arith.constant -1640531527 : i32
    %8 = vector.broadcast %c-1640531527_i32 : i32 to vector<2x1024xi32>
    %9 = arith.muli %7, %8 : vector<2x1024xi32>
    %c1234_i32 = arith.constant 1234 : i32
    %10 = vector.broadcast %c1234_i32 : i32 to vector<2x1024xi32>
    %11 = arith.addi %9, %10 : vector<2x1024xi32>
    %c16_i32 = arith.constant 16 : i32
    %12 = vector.broadcast %c16_i32 : i32 to vector<2x1024xi32>
    %13 = arith.shrui %11, %12 : vector<2x1024xi32>
    %14 = arith.xori %11, %13 : vector<2x1024xi32>
    %c569420461_i32 = arith.constant 569420461 : i32
    %15 = vector.broadcast %c569420461_i32 : i32 to vector<2x1024xi32>
    %16 = arith.muli %14, %15 : vector<2x1024xi32>
    %c15_i32 = arith.constant 15 : i32
    %17 = vector.broadcast %c15_i32 : i32 to vector<2x1024xi32>
    %18 = arith.shrui %16, %17 : vector<2x1024xi32>
    %19 = arith.xori %16, %18 : vector<2x1024xi32>
    %c1935289751_i32 = arith.constant 1935289751 : i32
    %20 = vector.broadcast %c1935289751_i32 : i32 to vector<2x1024xi32>
    %21 = arith.muli %19, %20 : vector<2x1024xi32>
    %c15_i32_0 = arith.constant 15 : i32
    %22 = vector.broadcast %c15_i32_0 : i32 to vector<2x1024xi32>
    %23 = arith.shrui %21, %22 : vector<2x1024xi32>
    %24 = arith.xori %21, %23 : vector<2x1024xi32>
    %c-1288490189_i32 = arith.constant -1288490189 : i32
    %25 = vector.broadcast %c-1288490189_i32 : i32 to vector<2x1024xi32>
    %26 = arith.cmpi ult, %24, %25 : vector<2x1024xi32>
    %c0 = arith.constant 0 : index
    %c0_1 = arith.constant 0 : index
    %27 = vector.load %arg1[%c0, %c0_1] : memref<2x1024xf32, #tpu.memory_space<vmem>>, vector<2x1024xf32>
    %cst = arith.constant 1.42857146 : f32
    %28 = vector.broadcast %cst : f32 to vector<2x1024xf32>
    %29 = arith.mulf %27, %28 : vector<2x1024xf32>
    %cst_2 = arith.constant 0.000000e+00 : f32
    %30 = vector.broadcast %cst_2 : f32 to vector<2x1024xf32>
    %31 = arith.select %26, %29, %30 : vector<2x1024xi1>, vector<2x1024xf32>
    %c0_3 = arith.constant 0 : index
    %c0_4 = arith.constant 0 : index
    %32 = vector.load %arg2[%c0_3, %c0_4] : memref<2x1024xf32, #tpu.memory_space<vmem>>, vector<2x1024xf32>
    tpu.vector_store %arg2[%c0_3, %c0_4], %31 {strides = array<i32>} : memref<2x1024xf32, #tpu.memory_space<vmem>>, vector<2x1024xf32>,
    return
  }
  func.func @transform_0(%arg0: i32) -> (i32, i32) {
    %c0_i32 = arith.constant 0 : i32
    %c0_i32_0 = arith.constant 0 : i32
    return %arg0, %c0_i32 : i32, i32
  }
  func.func @transform_1(%arg0: i32) -> (i32, i32) {
    %c0_i32 = arith.constant 0 : i32
    %c0_i32_0 = arith.constant 0 : i32
    return %arg0, %c0_i32 : i32, i32
  }
}

</mosaic_0001>

<bundles_post_ra>
// kernel: tpu_custom_call.1
= control target key start
LH: loop header
LB: loop body
LE: loop exit
PB: predicated region body
PF: predicated region fallthrough
CT: control target
= control target key end

     0   :  { %6 = vsyncpa [#allocation3], 0  ;;  %s325_s0 = inlined_call_operand.hbm [shape: f32[2,1024], index: 0, kind: input, shape index: {}]   ;;  %s326_s1 = inlined_call_operand.hbm [shape: f32[2,1024], index: 1, kind: output, shape index: {}]  }
   0x1   :  { %7 = vsyncpa [#allocation4], 0  ;;  %s13_s8 = sshll.u32 %s325_s0, 4  ;;  %s289_s9 = smov [#allocation2]   ;;  %s14_s8 = int_to_ptr.hbm [resolvable:$true] %s13_s8 }
   0x2   :  { %s15_s10 = sshll.u32 %s289_s9, 4  ;;  %s16_s10 = int_to_ptr.vmem [resolvable:$true] %s15_s10 }
   0x3   :  { %18 = dma.hbm_to_vmem [thread:$0]  %s14_s8, 256, %s16_s10, [#allocation3]  }
   0x4   :  { %285 = dma.done.wait [#allocation3], 256  }
   0x5   :  { %286 = vsyncadd [#allocation3], 4294967040  ;;  %v23_v0 = vlaneseq  ;;  %v150_v15 = vld [vmem:[#allocation2] sm:$0xff]  ;;  %v151_v16 = vld [vmem:[#allocation2 + $0x8] sm:$0xff]  ;;  %vm197_vm0 = vcmask 1041408   ;;  %vm199_vm1 = vcmask 1045508  }
   0x6   :  { %v152_v19 = vmul.f32 1.4285715, %v150_v15  ;;  %v153_v20 = vmul.f32 1.4285715, %v151_v16  ;;  %vm201_vm6 = vcmask 1043456   ;;  %s290_s0 = smov [#allocation5]  }
   0x7   :  { %v24_v1 = vshrl.u32 %v23_v0, 7  ;;  %v26_v2 = vand.u32 127, %v23_v0  ;;  %s215_s11 = sshll.u32 %s290_s0, 4  ;;  %s217_s14 = sshll.u32 %s326_s1, 4  ;;  %s216_s11 = int_to_ptr.vmem [resolvable:$true] %s215_s11  ;;  %s218_s14 = int_to_ptr.hbm [resolvable:$true] %s217_s14 }
   0x8   :  { %156 = vst [vmem:[#allocation1] ss:$4 sm:$0xff] %v152_v19 }
   0x9   :  { %v27_v3 = vadd.s32 128, %v26_v2  ;;  %v28_v4 = vadd.s32 256, %v26_v2  ;;  %v29_v5 = vadd.s32 384, %v26_v2  ;;  %v37_v6 = vmul.u32 1024, %v24_v1  ;;  %158 = vst [vmem:[#allocation1 + $0x20] ss:$4 sm:$0xff] %v153_v20 }
   0xa   :  { %v30_v7 = vadd.s32 512, %v26_v2  ;;  %v31_v8 = vadd.s32 640, %v26_v2  ;;  %v32_v9 = vadd.s32 768, %v26_v2  ;;  %v33_v10 = vadd.s32 896, %v26_v2 }
   0xb   :  { %v38_v11 = vadd.s32 %v37_v6, %v26_v2  ;;  %v39_v12 = vadd.s32 %v37_v6, %v27_v3  ;;  %v40_v13 = vadd.s32 %v37_v6, %v28_v4  ;;  %v41_v14 = vadd.s32 %v37_v6, %v29_v5 }
   0xc   :  { %v42_v17 = vadd.s32 %v37_v6, %v30_v7  ;;  %v43_v18 = vadd.s32 %v37_v6, %v31_v8  ;;  %v44_v22 = vadd.s32 %v37_v6, %v32_v9  ;;  %v45_v26 = vadd.s32 %v37_v6, %v33_v10 }
   0xd   :  { %v46_v21 = vmul.u32 2654435769, %v38_v11  ;;  %v47_v23 = vmul.u32 2654435769, %v39_v12  ;;  %v48_v24 = vmul.u32 2654435769, %v40_v13 }
   0xe   :  { %v49_v25 = vmul.u32 2654435769, %v41_v14  ;;  %v50_v28 = vmul.u32 2654435769, %v42_v17  ;;  %v51_v33 = vmul.u32 2654435769, %v43_v18 }
   0xf   :  { %v54_v27 = vadd.s32 1234, %v46_v21  ;;  %v55_v29 = vadd.s32 1234, %v47_v23  ;;  %v56_v30 = vadd.s32 1234, %v48_v24  ;;  %v52_v34 = vmul.u32 2654435769, %v44_v22 }
  0x10   :  { %v57_v31 = vadd.s32 1234, %v49_v25  ;;  %v58_v35 = vadd.s32 1234, %v50_v28  ;;  %v53_v39 = vmul.u32 2654435769, %v45_v26  ;;  %v59_v41 = vadd.s32 1234, %v51_v33 }
  0x11   :  { %v62_v32 = vshrl.u32 %v54_v27, 16  ;;  %v63_v36 = vshrl.u32 %v55_v29, 16  ;;  %v64_v37 = vshrl.u32 %v56_v30, 16  ;;  %v60_v42 = vadd.s32 1234, %v52_v34 }
  0x12   :  { %v65_v38 = vshrl.u32 %v57_v31, 16  ;;  %v66_v43 = vshrl.u32 %v58_v35, 16  ;;  %v61_v47 = vadd.s32 1234, %v53_v39  ;;  %v67_v49 = vshrl.u32 %v59_v41, 16 }
  0x13   :  { %v70_v40 = vxor.u32 %v62_v32, %v54_v27  ;;  %v71_v44 = vxor.u32 %v63_v36, %v55_v29  ;;  %v72_v45 = vxor.u32 %v64_v37, %v56_v30  ;;  %v68_v50 = vshrl.u32 %v60_v42, 16  ;;  %v160_v25 = vld.sshfl [vmem:[#allocation1 + $0x8] sm:$0xff pattern:$0x73625140] }
  0x14   :  { %v73_v46 = vxor.u32 %v65_v38, %v57_v31  ;;  %v74_v54 = vxor.u32 %v66_v43, %v58_v35  ;;  %v69_v56 = vshrl.u32 %v61_v47, 16  ;;  %v75_v57 = vxor.u32 %v67_v49, %v59_v41  ;;  %v161_v26 = vld.sshfl [vmem:[#allocation1 + $0x10] sm:$0xff pattern:$0x73625140] }
  0x15   :  { %v78_v48 = vmul.u32 569420461, %v70_v40  ;;  %v79_v51 = vmul.u32 569420461, %v71_v44  ;;  %v80_v52 = vmul.u32 569420461, %v72_v45  ;;  %v76_v58 = vxor.u32 %v68_v50, %v60_v42 }
  0x16   :  { %v81_v53 = vmul.u32 569420461, %v73_v46  ;;  %v77_v63 = vxor.u32 %v69_v56, %v61_v47  ;;  %v82_v3 = vmul.u32 569420461, %v74_v54  ;;  %v83_v5 = vmul.u32 569420461, %v75_v57 }
  0x17   :  { %v86_v55 = vshrl.u32 %v78_v48, 15  ;;  %v87_v59 = vshrl.u32 %v79_v51, 15  ;;  %v88_v60 = vshrl.u32 %v80_v52, 15  ;;  %v84_v6 = vmul.u32 569420461, %v76_v58 }
  0x18   :  { %v89_v61 = vshrl.u32 %v81_v53, 15  ;;  %v85_v11 = vmul.u32 569420461, %v77_v63  ;;  %v90_v12 = vshrl.u32 %v82_v3, 15  ;;  %v91_v13 = vshrl.u32 %v83_v5, 15 }
  0x19   :  { %v94_v62 = vxor.u32 %v86_v55, %v78_v48  ;;  %v95_v0 = vxor.u32 %v87_v59, %v79_v51  ;;  %v96_v1 = vxor.u32 %v88_v60, %v80_v52  ;;  %v92_v17 = vshrl.u32 %v84_v6, 15  ;;  %v162_v27 = vld.sshfl [vmem:[#allocation1 + $0x18] sm:$0xff pattern:$0x73625140] }
  0x1a   :  { %v97_v2 = vxor.u32 %v89_v61, %v81_v53  ;;  %v93_v19 = vshrl.u32 %v85_v11, 15  ;;  %v98_v20 = vxor.u32 %v90_v12, %v82_v3  ;;  %v99_v21 = vxor.u32 %v91_v13, %v83_v5  ;;  %v159_v36 = vld.sshfl [vmem:[#allocation1] sm:$0xff pattern:$0x73625140] }
  0x1b   :  { %v102_v4 = vmul.u32 1935289751, %v94_v62  ;;  %v103_v7 = vmul.u32 1935289751, %v95_v0  ;;  %v104_v8 = vmul.u32 1935289751, %v96_v1  ;;  %v100_v28 = vxor.u32 %v92_v17, %v84_v6 }
  0x1c   :  { %v105_v9 = vmul.u32 1935289751, %v97_v2  ;;  %v101_v30 = vxor.u32 %v93_v19, %v85_v11  ;;  %v106_v31 = vmul.u32 1935289751, %v98_v20  ;;  %v107_v32 = vmul.u32 1935289751, %v99_v21 }
  0x1d   :  { %v110_v10 = vshrl.u32 %v102_v4, 15  ;;  %v111_v14 = vshrl.u32 %v103_v7, 15  ;;  %v112_v15 = vshrl.u32 %v104_v8, 15  ;;  %v108_v37 = vmul.u32 1935289751, %v100_v28 }
  0x1e   :  { %v113_v16 = vshrl.u32 %v105_v9, 15  ;;  %v109_v39 = vmul.u32 1935289751, %v101_v30  ;;  %v114_v40 = vshrl.u32 %v106_v31, 15  ;;  %v115_v41 = vshrl.u32 %v107_v32, 15 }
  0x1f   :  { %v118_v18 = vxor.u32 %v110_v10, %v102_v4  ;;  %v119_v22 = vxor.u32 %v111_v14, %v103_v7  ;;  %v120_v23 = vxor.u32 %v112_v15, %v104_v8  ;;  %v116_v48 = vshrl.u32 %v108_v37, 15  ;;  %v164_v56 = vld.sshfl [vmem:[#allocation1 + $0x28] sm:$0xff pattern:$0x73625140] }
  0x20   :  { %v121_v24 = vxor.u32 %v113_v16, %v105_v9  ;;  %v117_v50 = vshrl.u32 %v109_v39, 15  ;;  %v122_v51 = vxor.u32 %v114_v40, %v106_v31  ;;  %v123_v52 = vxor.u32 %v115_v41, %v107_v32  ;;  %v163_v61 = vld.sshfl [vmem:[#allocation1 + $0x20] sm:$0xff pattern:$0x73625140] }
  0x21   :  { %v227_v29 = vxor.u32 2147483648, %v118_v18  ;;  %v228_v33 = vxor.u32 2147483648, %v119_v22  ;;  %v229_v34 = vxor.u32 2147483648, %v120_v23  ;;  %v124_v55 = vxor.u32 %v116_v48, %v108_v37  ;;  %v165_v62 = vld.sshfl [vmem:[#allocation1 + $0x30] sm:$0xff pattern:$0x73625140] }
  0x22   :  { %v230_v35 = vxor.u32 2147483648, %v121_v24  ;;  %v125_v58 = vxor.u32 %v117_v50, %v109_v39  ;;  %v231_v59 = vxor.u32 2147483648, %v122_v51  ;;  %v232_v60 = vxor.u32 2147483648, %v123_v52  ;;  %v166_v0 = vld.sshfl [vmem:[#allocation1 + $0x38] sm:$0xff pattern:$0x73625140] }
  0x23   :  { %vm304_vm2 = vcmp.lt.s32.totalorder %v227_v29, 858993459  ;;  %vm131_vm3 = vcmp.lt.s32.totalorder %v228_v33, 858993459  ;;  %vm134_vm4 = vcmp.lt.s32.totalorder %v229_v34, 858993459 }
  0x24   :  { %vm137_vm5 = vcmp.lt.s32.totalorder %v230_v35, 858993459  ;;  %v176_v42 = vsel %vm131_vm3, %v160_v25, 0.0  ;;  %v177_v43 = vsel %vm134_vm4, %v161_v26, 0.0  ;;  %v175_v49 = vsel %vm304_vm2, %v159_v36, 0.0 }
  0x25   :  { %v178_v44 = vsel %vm137_vm5, %v162_v27, 0.0  ;;  %v191_v45 = vrot.slane %v176_v42, 6  ;;  %v192_v46 = vrot.slane %v177_v43, 4  ;;  %v233_v63 = vxor.u32 2147483648, %v124_v55 }
  0x26   :  { %v193_v47 = vrot.slane %v178_v44, 2  ;;  %vm313_vm7 = vcmp.lt.s32.totalorder %v231_v59, 858993459  ;;  %vm143_vm8 = vcmp.lt.s32.totalorder %v232_v60, 858993459  ;;  %v234_v2 = vxor.u32 2147483648, %v125_v58 }
  0x27   :  { %v198_v53 = vsel %vm197_vm0, %v175_v49, %v191_v45  ;;  %vm146_vm9 = vcmp.lt.s32.totalorder %v233_v63, 858993459  ;;  %v180_v3 = vsel %vm143_vm8, %v164_v56, 0.0  ;;  %v179_v6 = vsel %vm313_vm7, %v163_v61, 0.0 }
  0x28   :  { %v200_v54 = vsel %vm199_vm1, %v192_v46, %v193_v47  ;;  %vm149_vm10 = vcmp.lt.s32.totalorder %v234_v2, 858993459  ;;  %v181_v4 = vsel %vm146_vm9, %v165_v62, 0.0  ;;  %v194_v5 = vrot.slane %v180_v3, 6 }
  0x29   :  { %v202_v57 = vsel %vm201_vm6, %v198_v53, %v200_v54  ;;  %v182_v7 = vsel %vm149_vm10, %v166_v0, 0.0  ;;  %v195_v8 = vrot.slane %v181_v4, 4 }
  0x2a   :  { %208 = vst [vmem:[#allocation5] sm:$0xff] %v202_v57  ;;  %v196_v9 = vrot.slane %v182_v7, 2  ;;  %v203_v10 = vsel %vm197_vm0, %v179_v6, %v194_v5 }
  0x2c   :  { %v204_v11 = vsel %vm199_vm1, %v195_v8, %v196_v9 }
  0x2d   :  { %v205_v12 = vsel %vm201_vm6, %v203_v10, %v204_v11 }
  0x2e   :  { %209 = vst [vmem:[#allocation5 + $0x8] sm:$0xff] %v205_v12 }
  0x2f   :  { %220 = dma.vmem_to_hbm [thread:$0]  %s216_s11, 256, %s218_s14, [#allocation4]  }
  0x30   :  { %287 = dma.done.wait [#allocation4], 256  }
  0x31   :  { %288 = vsyncadd [#allocation4], 4294967040 }
  0x32   :  { %225 = vsyncpa [#allocation3], 1 }
  0x33   :  { %226 = vsyncpa [#allocation4], 1 }

</bundles_post_ra>
